<compile_context>
chip_gen: v7x
topology: tpu7x:2x2x1
jax: 0.10.0
libtpu: 0.0.40
codegen_flags: <defaults>
</compile_context>

<pallas_src>
import jax
import jax.numpy as jnp
from jax.experimental import pallas as pl
from jax.experimental.pallas import tpu as pltpu

LANE = 128  # TPU lane width; output columns padded up to a multiple of this.


def mlp_kernel(x_ref, w1_ref, b1_ref, w2_ref, b2_ref, w3_ref, b3_ref, o_ref):
    """Fused 3-layer MLP over the whole batch (single grid step).

    All three matmuls run on the MXU with bf16 inputs and f32 accumulation;
    bias-add / ReLU / casts run on the VPU.  No scratch, no reduction axis.
    """
    # Cast x to bf16 in-kernel (free VPU slot) instead of a wrapper-side XLA op.
    x = x_ref[...].astype(jnp.bfloat16)

    # Layer 1: (B, Din) @ (Din, Dh) + b1 -> ReLU
    h = jnp.dot(x, w1_ref[...], preferred_element_type=jnp.float32)
    h = jnp.maximum(h + b1_ref[...], 0.0)

    # Layer 2: (B, Dh) @ (Dh, Dh) + b2 -> ReLU
    h = jnp.dot(h.astype(jnp.bfloat16), w2_ref[...],
                preferred_element_type=jnp.float32)
    h = jnp.maximum(h + b2_ref[...], 0.0)

    # Layer 3: (B, Dh) @ (Dh, Dpad) + b3  (Dpad = Dout padded to 128 columns
    # -> full-lane, unmasked output store; extra MXU columns are free here.)
    out = jnp.dot(h.astype(jnp.bfloat16), w3_ref[...],
                  preferred_element_type=jnp.float32)
    o_ref[...] = (out + b3_ref[...]).astype(o_ref.dtype)


def prepare_params(w1, b1, w2, b2, w3, b3):
    """One-time (model-load) parameter prep: bf16 weight casts + lane padding.

    Do this ONCE, not per forward call -- re-casting weights every call adds
    4 tiny HBM read+write XLA ops on a latency-bound path.
    """
    din, dh = w1.shape
    dout = w3.shape[1]
    dpad = max(LANE, ((dout + LANE - 1) // LANE) * LANE)
    w3p = jnp.zeros((dh, dpad), jnp.float32).at[:, :dout].set(w3)
    b3p = jnp.zeros((dpad,), jnp.float32).at[:dout].set(b3)
    return {
        "w1": w1.astype(jnp.bfloat16),
        "b1": b1.reshape(1, dh).astype(jnp.float32),
        "w2": w2.astype(jnp.bfloat16),
        "b2": b2.reshape(1, dh).astype(jnp.float32),
        "w3": w3p.astype(jnp.bfloat16),
        "b3": b3p.reshape(1, dpad).astype(jnp.float32),
    }


def mlp_forward(x, params, dout):
    """x: [B, Din] float32; params from prepare_params(); returns [B, dout] f32."""
    B, Din = x.shape
    Dh = params["w1"].shape[1]
    Dpad = params["w3"].shape[1]

    flops = 2 * B * (Din * Dh + Dh * Dh + Dh * Dpad)
    bytes_accessed = (
        x.size * x.dtype.itemsize
        + sum(int(p.size) * p.dtype.itemsize for p in params.values())
        + B * Dpad * 4  # f32 output
    )

    out_padded = pl.pallas_call(
        mlp_kernel,
        out_shape=jax.ShapeDtypeStruct((B, Dpad), jnp.float32),
        grid_spec=pltpu.PrefetchScalarGridSpec(
            num_scalar_prefetch=0,
            grid=(1,),  # single step: latency-bound, whole batch in one tile
            in_specs=[
                pl.BlockSpec((B, Din), lambda i: (0, 0)),    # X (full batch)
                pl.BlockSpec((Din, Dh), lambda i: (0, 0)),   # W1 (resident)
                pl.BlockSpec((1, Dh), lambda i: (0, 0)),     # b1
                pl.BlockSpec((Dh, Dh), lambda i: (0, 0)),    # W2 (resident)
                pl.BlockSpec((1, Dh), lambda i: (0, 0)),     # b2
                pl.BlockSpec((Dh, Dpad), lambda i: (0, 0)),  # W3 (padded, resident)
                pl.BlockSpec((1, Dpad), lambda i: (0, 0)),   # b3 (padded)
            ],
            # Lane-dense (128-wide) output block -> unmasked vst stores.
            out_specs=pl.BlockSpec((B, Dpad), lambda i: (0, 0)),
        ),
        compiler_params=pltpu.CompilerParams(
            dimension_semantics=("arbitrary",)),
        cost_estimate=pl.CostEstimate(
            flops=flops, transcendentals=0, bytes_accessed=bytes_accessed),
    )(x, params["w1"], params["b1"], params["w2"], params["b2"],
      params["w3"], params["b3"])

    return out_padded[:, :dout]


if __name__ == "__main__":
    # Small shapes consistent with the module.
    B = 256     # batch_size
    Din = 64    # input_dim
    Dh = 128    # hidden_dim
    Dout = 32   # output_dim

    key = jax.random.PRNGKey(0)
    kx, k1, kb1, k2, kb2, k3, kb3 = jax.random.split(key, 7)

    # PyTorch init_weights: uniform(-stdv, stdv) with stdv = 1/sqrt(hidden_dim).
    stdv = 1.0 / (Dh ** 0.5)
    x = jax.random.normal(kx, (B, Din), dtype=jnp.float32)
    w1 = jax.random.uniform(k1, (Din, Dh), minval=-stdv, maxval=stdv, dtype=jnp.float32)
    b1 = jax.random.uniform(kb1, (Dh,), minval=-stdv, maxval=stdv, dtype=jnp.float32)
    w2 = jax.random.uniform(k2, (Dh, Dh), minval=-stdv, maxval=stdv, dtype=jnp.float32)
    b2 = jax.random.uniform(kb2, (Dh,), minval=-stdv, maxval=stdv, dtype=jnp.float32)
    w3 = jax.random.uniform(k3, (Dh, Dout), minval=-stdv, maxval=stdv, dtype=jnp.float32)
    b3 = jax.random.uniform(kb3, (Dout,), minval=-stdv, maxval=stdv, dtype=jnp.float32)

    # One-time param prep (bf16 cast + Dout->128 padding), then the forward.
    params = prepare_params(w1, b1, w2, b2, w3, b3)
    out = mlp_forward(x, params, Dout)
    out = jax.block_until_ready(out)

    # Pure-JAX f32 reference of the PyTorch forward.
    h1 = jnp.maximum(x @ w1 + b1, 0.0)
    h2 = jnp.maximum(h1 @ w2 + b2, 0.0)
    ref = h2 @ w3 + b3

    assert out.shape == (B, Dout)
    # bf16 MXU inputs with f32 accumulation -> tolerance loosened vs strict f32.
    assert jnp.allclose(out, ref, atol=2e-2, rtol=2e-2), \
        f"max abs err {jnp.max(jnp.abs(out - ref))}"

    print("KERNEL_OK")
</pallas_src>

<mosaic_0001>
module attributes {stable_mosaic.version = 11 : i64} {
  func.func @mlp_kernel(%arg0: i32, %arg1: memref<256x64xf32, #tpu.memory_space<vmem>>, %arg2: memref<64x128xbf16, #tpu.memory_space<vmem>>, %arg3: memref<1x128xf32, #tpu.memory_space<vmem>>, %arg4: memref<128x128xbf16, #tpu.memory_space<vmem>>, %arg5: memref<1x128xf32, #tpu.memory_space<vmem>>, %arg6: memref<128x128xbf16, #tpu.memory_space<vmem>>, %arg7: memref<1x128xf32, #tpu.memory_space<vmem>>, %arg8: memref<256x128xf32, #tpu.memory_space<vmem>>) attributes {dimension_semantics = [#tpu.dimension_semantics<arbitrary>], iteration_bounds = array<i64: 1>, scalar_prefetch = 0 : i64, scratch_operands = 0 : i64, tpu.core_type = #tpu.core_type<tc>, window_params = [{pipeline_mode = #tpu.pipeline_mode<synchronous>, transform_indices = @transform_0, window_bounds = array<i64: 256, 64>}, {pipeline_mode = #tpu.pipeline_mode<synchronous>, transform_indices = @transform_1, window_bounds = array<i64: 64, 128>}, {pipeline_mode = #tpu.pipeline_mode<synchronous>, transform_indices = @transform_2, window_bounds = array<i64: 1, 128>}, {pipeline_mode = #tpu.pipeline_mode<synchronous>, transform_indices = @transform_3, window_bounds = array<i64: 128, 128>}, {pipeline_mode = #tpu.pipeline_mode<synchronous>, transform_indices = @transform_4, window_bounds = array<i64: 1, 128>}, {pipeline_mode = #tpu.pipeline_mode<synchronous>, transform_indices = @transform_5, window_bounds = array<i64: 128, 128>}, {pipeline_mode = #tpu.pipeline_mode<synchronous>, transform_indices = @transform_6, window_bounds = array<i64: 1, 128>}, {pipeline_mode = #tpu.pipeline_mode<synchronous>, transform_indices = @transform_7, window_bounds = array<i64: 256, 128>}]} {
    %c0 = arith.constant 0 : index
    %c0_0 = arith.constant 0 : index
    %0 = vector.load %arg1[%c0, %c0_0] : memref<256x64xf32, #tpu.memory_space<vmem>>, vector<256x64xf32>
    %1 = arith.truncf %0 : vector<256x64xf32> to vector<256x64xbf16>
    %c0_1 = arith.constant 0 : index
    %c0_2 = arith.constant 0 : index
    %2 = vector.load %arg2[%c0_1, %c0_2] : memref<64x128xbf16, #tpu.memory_space<vmem>>, vector<64x128xbf16>
    %cst = arith.constant dense<0.000000e+00> : vector<256x128xf32>
    %3 = tpu.matmul %1, %2, %cst {dimension_numbers = #tpu.dot_dimension_numbers<[1], [0], [0], [1], [0, 0, 1, 1], [], []>} : vector<256x64xbf16>, vector<64x128xbf16>, vector<256x128xf32> -> vector<256x128xf32>
    %c0_3 = arith.constant 0 : index
    %c0_4 = arith.constant 0 : index
    %4 = vector.load %arg3[%c0_3, %c0_4] : memref<1x128xf32, #tpu.memory_space<vmem>>, vector<1x128xf32>
    %5 = vector.broadcast %4 : vector<1x128xf32> to vector<256x128xf32>
    %6 = arith.addf %3, %5 : vector<256x128xf32>
    %cst_5 = arith.constant 0.000000e+00 : f32
    %7 = vector.broadcast %cst_5 : f32 to vector<256x128xf32>
    %8 = arith.maximumf %6, %7 : vector<256x128xf32>
    %9 = arith.truncf %8 : vector<256x128xf32> to vector<256x128xbf16>
    %c0_6 = arith.constant 0 : index
    %c0_7 = arith.constant 0 : index
    %10 = vector.load %arg4[%c0_6, %c0_7] : memref<128x128xbf16, #tpu.memory_space<vmem>>, vector<128x128xbf16>
    %cst_8 = arith.constant dense<0.000000e+00> : vector<256x128xf32>
    %11 = tpu.matmul %9, %10, %cst_8 {dimension_numbers = #tpu.dot_dimension_numbers<[1], [0], [0], [1], [0, 0, 1, 1], [], []>} : vector<256x128xbf16>, vector<128x128xbf16>, vector<256x128xf32> -> vector<256x128xf32>
    %c0_9 = arith.constant 0 : index
    %c0_10 = arith.constant 0 : index
    %12 = vector.load %arg5[%c0_9, %c0_10] : memref<1x128xf32, #tpu.memory_space<vmem>>, vector<1x128xf32>
    %13 = vector.broadcast %12 : vector<1x128xf32> to vector<256x128xf32>
    %14 = arith.addf %11, %13 : vector<256x128xf32>
    %cst_11 = arith.constant 0.000000e+00 : f32
    %15 = vector.broadcast %cst_11 : f32 to vector<256x128xf32>
    %16 = arith.maximumf %14, %15 : vector<256x128xf32>
    %17 = arith.truncf %16 : vector<256x128xf32> to vector<256x128xbf16>
    %c0_12 = arith.constant 0 : index
    %c0_13 = arith.constant 0 : index
    %18 = vector.load %arg6[%c0_12, %c0_13] : memref<128x128xbf16, #tpu.memory_space<vmem>>, vector<128x128xbf16>
    %cst_14 = arith.constant dense<0.000000e+00> : vector<256x128xf32>
    %19 = tpu.matmul %17, %18, %cst_14 {dimension_numbers = #tpu.dot_dimension_numbers<[1], [0], [0], [1], [0, 0, 1, 1], [], []>} : vector<256x128xbf16>, vector<128x128xbf16>, vector<256x128xf32> -> vector<256x128xf32>
    %c0_15 = arith.constant 0 : index
    %c0_16 = arith.constant 0 : index
    %20 = vector.load %arg7[%c0_15, %c0_16] : memref<1x128xf32, #tpu.memory_space<vmem>>, vector<1x128xf32>
    %21 = vector.broadcast %20 : vector<1x128xf32> to vector<256x128xf32>
    %22 = arith.addf %19, %21 : vector<256x128xf32>
    %c0_17 = arith.constant 0 : index
    %c0_18 = arith.constant 0 : index
    %23 = vector.load %arg8[%c0_17, %c0_18] : memref<256x128xf32, #tpu.memory_space<vmem>>, vector<256x128xf32>
    tpu.vector_store %arg8[%c0_17, %c0_18], %22 {strides = array<i32>} : memref<256x128xf32, #tpu.memory_space<vmem>>, vector<256x128xf32>,
    return
  }
  func.func @transform_0(%arg0: i32) -> (i32, i32) {
    %c0_i32 = arith.constant 0 : i32
    %c0_i32_0 = arith.constant 0 : i32
    %c0_i32_1 = arith.constant 0 : i32
    return %c0_i32, %c0_i32_0 : i32, i32
  }
  func.func @transform_1(%arg0: i32) -> (i32, i32) {
    %c0_i32 = arith.constant 0 : i32
    %c0_i32_0 = arith.constant 0 : i32
    %c0_i32_1 = arith.constant 0 : i32
    return %c0_i32, %c0_i32_0 : i32, i32
  }
  func.func @transform_2(%arg0: i32) -> (i32, i32) {
    %c0_i32 = arith.constant 0 : i32
    %c0_i32_0 = arith.constant 0 : i32
    %c0_i32_1 = arith.constant 0 : i32
    return %c0_i32, %c0_i32_0 : i32, i32
  }
  func.func @transform_3(%arg0: i32) -> (i32, i32) {
    %c0_i32 = arith.constant 0 : i32
    %c0_i32_0 = arith.constant 0 : i32
    %c0_i32_1 = arith.constant 0 : i32
    return %c0_i32, %c0_i32_0 : i32, i32
  }
  func.func @transform_4(%arg0: i32) -> (i32, i32) {
    %c0_i32 = arith.constant 0 : i32
    %c0_i32_0 = arith.constant 0 : i32
    %c0_i32_1 = arith.constant 0 : i32
    return %c0_i32, %c0_i32_0 : i32, i32
  }
  func.func @transform_5(%arg0: i32) -> (i32, i32) {
    %c0_i32 = arith.constant 0 : i32
    %c0_i32_0 = arith.constant 0 : i32
    %c0_i32_1 = arith.constant 0 : i32
    return %c0_i32, %c0_i32_0 : i32, i32
  }
  func.func @transform_6(%arg0: i32) -> (i32, i32) {
    %c0_i32 = arith.constant 0 : i32
    %c0_i32_0 = arith.constant 0 : i32
    %c0_i32_1 = arith.constant 0 : i32
    return %c0_i32, %c0_i32_0 : i32, i32
  }
  func.func @transform_7(%arg0: i32) -> (i32, i32) {
    %c0_i32 = arith.constant 0 : i32
    %c0_i32_0 = arith.constant 0 : i32
    %c0_i32_1 = arith.constant 0 : i32
    return %c0_i32, %c0_i32_0 : i32, i32
  }
}

</mosaic_0001>

<bundles_post_ra>
// kernel: tpu_custom_call.1
= control target key start
LH: loop header
LB: loop body
LE: loop exit
PB: predicated region body
PF: predicated region fallthrough
CT: control target
= control target key end

     0   :  { %vm115_vm0 = vcmask 523264   ;;  %s1578_s0 = inlined_call_operand.vmem [shape: f32[256,64], index: 0, kind: input, shape index: {}]   ;;  %s1579_s1 = inlined_call_operand.vmem [shape: bf16[64,128], index: 1, kind: input, shape index: {}]   ;;  %s1580_s2 = inlined_call_operand.vmem [shape: f32[1,128], index: 2, kind: input, shape index: {}]   ;;  %s1581_s3 = inlined_call_operand.vmem [shape: bf16[128,128], index: 3, kind: input, shape index: {}]   ;;  %s1582_s4 = inlined_call_operand.vmem [shape: f32[1,128], index: 4, kind: input, shape index: {}]   ;;  %s1583_s5 = inlined_call_operand.vmem [shape: bf16[128,128], index: 5, kind: input, shape index: {}]   ;;  %s1584_s6 = inlined_call_operand.vmem [shape: f32[1,128], index: 6, kind: input, shape index: {}]   ;;  %s1585_s7 = inlined_call_operand.hbm [shape: f32[256,128], index: 7, kind: output, shape index: {}]  }
   0x1   :  { %v1187_v0 = vld [vmem:[%s1579_s1] sm:$0xff]   ;;  %v1188_v1 = vld [vmem:[%s1579_s1 + $0x8] sm:$0xff]   ;;  %v1189_v2 = vld [vmem:[%s1579_s1 + $0x10] sm:$0xff]  }
   0x2   :  { %1040 = vmatprep.subr.bf16.mxu0 %v1187_v0  ;;  %1176 = vmatprep.subr.bf16.mxu1 %v1187_v0  ;;  %v28_v3 = vld [vmem:[%s1578_s0] sm:$0xff]  ;;  %v29_v4 = vld [vmem:[%s1578_s0 + $0x8] sm:$0xff]  ;;  %v1190_v6 = vld [vmem:[%s1579_s1 + $0x18] sm:$0xff]  }
   0x3   :  { %1041 = vmatpush3.bf16.msra.mxu0 %v1187_v0  ;;  %1180 = vmatpush3.bf16.msra.mxu1 %v1187_v0  ;;  %v60_v5 = vpack.c.bf16 %v29_v4, %v28_v3  ;;  %v44_v7 = vld [vmem:[%s1578_s0 + $0x80] sm:$0xff]  ;;  %v45_v8 = vld [vmem:[%s1578_s0 + $0x88] sm:$0xff]  ;;  %v30_v10 = vld [vmem:[%s1578_s0 + $0x10] sm:$0xff] }
   0x4   :  { %1042 = vmatprep.subr.bf16.mxu0 %v1188_v1  ;;  %1177 = vmatprep.subr.bf16.mxu1 %v1188_v1  ;;  %v68_v9 = vpack.c.bf16 %v45_v8, %v44_v7  ;;  %v31_v11 = vld [vmem:[%s1578_s0 + $0x18] sm:$0xff]  ;;  %v32_v12 = vld [vmem:[%s1578_s0 + $0x20] sm:$0xff]  ;;  %v33_v13 = vld [vmem:[%s1578_s0 + $0x28] sm:$0xff] }
   0x5   :  { %1048 = vmatprep.mubr.msk.bf16.mxu0 %vm115_vm0, %v60_v5  ;;  %v46_v14 = vld [vmem:[%s1578_s0 + $0x90] sm:$0xff]  ;;  %v47_v15 = vld [vmem:[%s1578_s0 + $0x98] sm:$0xff]  ;;  %v48_v16 = vld [vmem:[%s1578_s0 + $0xa0] sm:$0xff]  ;;  %v61_v18 = vpack.c.bf16 %v31_v11, %v30_v10  ;;  %v62_v19 = vpack.c.bf16 %v33_v13, %v32_v12 }
   0x6   :  { %1064 = vmatprep.mubr.msk.bf16.mxu1 %vm115_vm0, %v68_v9  ;;  %v49_v17 = vld [vmem:[%s1578_s0 + $0xa8] sm:$0xff]  ;;  %v69_v20 = vpack.c.bf16 %v47_v15, %v46_v14  ;;  %v1191_v21 = vld [vmem:[%s1581_s3] sm:$0xff]   ;;  %v34_v23 = vld [vmem:[%s1578_s0 + $0x30] sm:$0xff] }
   0x7   :  { %1043 = vmatpush3.bf16.msra.mxu0 %v1188_v1  ;;  %1181 = vmatpush3.bf16.msra.mxu1 %v1188_v1  ;;  %v70_v22 = vpack.c.bf16 %v49_v17, %v48_v16  ;;  %v35_v24 = vld [vmem:[%s1578_s0 + $0x38] sm:$0xff]  ;;  %v1192_v25 = vld [vmem:[%s1581_s3 + $0x8] sm:$0xff]   ;;  %v36_v26 = vld [vmem:[%s1578_s0 + $0x40] sm:$0xff] }
   0x8   :  { %1044 = vmatprep.subr.bf16.mxu0 %v1189_v2  ;;  %1178 = vmatprep.subr.bf16.mxu1 %v1189_v2  ;;  %v37_v27 = vld [vmem:[%s1578_s0 + $0x48] sm:$0xff]  ;;  %v50_v28 = vld [vmem:[%s1578_s0 + $0xb0] sm:$0xff]  ;;  %v51_v29 = vld [vmem:[%s1578_s0 + $0xb8] sm:$0xff]  ;;  %v63_v33 = vpack.c.bf16 %v35_v24, %v34_v23 }
   0x9   :  { %v52_v30 = vld [vmem:[%s1578_s0 + $0xc0] sm:$0xff]  ;;  %v53_v31 = vld [vmem:[%s1578_s0 + $0xc8] sm:$0xff]  ;;  %v1193_v32 = vld [vmem:[%s1581_s3 + $0x10] sm:$0xff]   ;;  %v64_v34 = vpack.c.bf16 %v37_v27, %v36_v26  ;;  %v71_v35 = vpack.c.bf16 %v51_v29, %v50_v28 }
   0xa   :  { %v1194_v36 = vld [vmem:[%s1581_s3 + $0x18] sm:$0xff]   ;;  %v72_v37 = vpack.c.bf16 %v53_v31, %v52_v30  ;;  %v38_v38 = vld [vmem:[%s1578_s0 + $0x50] sm:$0xff]  ;;  %v40_v40 = vld [vmem:[%s1578_s0 + $0x60] sm:$0xff] }
   0xb   :  { %1045 = vmatpush3.bf16.msra.mxu0 %v1189_v2  ;;  %1182 = vmatpush3.bf16.msra.mxu1 %v1189_v2  ;;  %v39_v39 = vld [vmem:[%s1578_s0 + $0x58] sm:$0xff] }
   0xc   :  { %1046 = vmatprep.subr.bf16.mxu0 %v1190_v6  ;;  %1179 = vmatprep.subr.bf16.mxu1 %v1190_v6 }
   0xf   :  { %1047 = vmatpush3.bf16.msra.mxu0 %v1190_v6  ;;  %1183 = vmatpush3.bf16.msra.mxu1 %v1190_v6 }
  0x10   :  { %1080 = vmatprep.subr.bf16.mxu1 %v1191_v21 }
  0x12   :  { %1049 = vmatmul.mubr.msk.bf16.vlgmr.msra.gmra.mrb[0].mxu0 %vm115_vm0, %v61_v18  ;;  %1065 = vmatmul.mubr.msk.bf16.vlgmr.msra.gmra.mrb[0].mxu1 %vm115_vm0, %v69_v20 }
  0x13   :  { %1052 = vmatprep.mubr.msk.bf16.mxu0 %vm115_vm0, %v62_v19  ;;  %1068 = vmatprep.mubr.msk.bf16.mxu1 %vm115_vm0, %v70_v22 }
  0x14   :  { %1081 = vmatpush3.bf16.msra.mxu1 %v1191_v21 }
  0x15   :  { %1082 = vmatprep.subr.bf16.mxu1 %v1192_v25 }
  0x18   :  { %1083 = vmatpush3.bf16.msra.mxu1 %v1192_v25 }
  0x19   :  { %1084 = vmatprep.subr.bf16.mxu1 %v1193_v32 }
  0x1a   :  { %1053 = vmatmul.mubr.msk.bf16.gmra.mrb[4].mxu0 %vm115_vm0, %v63_v33  ;;  %1069 = vmatmul.mubr.msk.bf16.gmra.mrb[4].mxu1 %vm115_vm0, %v71_v35 }
  0x1b   :  { %1056 = vmatprep.mubr.msk.bf16.mxu0 %vm115_vm0, %v64_v34 }
  0x1c   :  { %12 = vsyncpa [#allocation3], 0  ;;  %v41_v41 = vld [vmem:[%s1578_s0 + $0x68] sm:$0xff]  ;;  %1072 = vmatprep.mubr.msk.bf16.mxu1 %vm115_vm0, %v72_v37  ;;  %v54_v42 = vld [vmem:[%s1578_s0 + $0xd0] sm:$0xff]  ;;  %1085 = vmatpush3.bf16.msra.mxu1 %v1193_v32  ;;  %v65_v47 = vpack.c.bf16 %v39_v39, %v38_v38 }
  0x1d   :  { %v55_v43 = vld [vmem:[%s1578_s0 + $0xd8] sm:$0xff]  ;;  %v56_v44 = vld [vmem:[%s1578_s0 + $0xe0] sm:$0xff]  ;;  %v57_v45 = vld [vmem:[%s1578_s0 + $0xe8] sm:$0xff]  ;;  %1086 = vmatprep.subr.bf16.mxu1 %v1194_v36  ;;  %v66_v48 = vpack.c.bf16 %v41_v41, %v40_v40 }
  0x1e   :  { %v1195_v46 = vld [vmem:[%s1581_s3 + $0x20] sm:$0xff]   ;;  %v73_v49 = vpack.c.bf16 %v55_v43, %v54_v42  ;;  %v74_v50 = vpack.c.bf16 %v57_v45, %v56_v44  ;;  %v1196_v51 = vld [vmem:[%s1581_s3 + $0x28] sm:$0xff]   ;;  %v42_v52 = vld [vmem:[%s1578_s0 + $0x70] sm:$0xff] }
  0x1f   :  { %v43_v53 = vld [vmem:[%s1578_s0 + $0x78] sm:$0xff]  ;;  %v58_v54 = vld [vmem:[%s1578_s0 + $0xf0] sm:$0xff]  ;;  %v1199_v60 = vld [vmem:[%s1583_s5] sm:$0xff]  }
  0x20   :  { %1087 = vmatpush3.bf16.msra.mxu1 %v1194_v36  ;;  %v59_v55 = vld [vmem:[%s1578_s0 + $0xf8] sm:$0xff]  ;;  %v67_v56 = vpack.c.bf16 %v43_v53, %v42_v52  ;;  %v1197_v58 = vld [vmem:[%s1581_s3 + $0x30] sm:$0xff]   ;;  %v1200_v61 = vld [vmem:[%s1583_s5 + $0x8] sm:$0xff]   ;;  %1128 = vmatprep.subr.bf16.mxu0 %v1199_v60 }
  0x21   :  { %1088 = vmatprep.subr.bf16.mxu1 %v1195_v46  ;;  %v75_v57 = vpack.c.bf16 %v59_v55, %v58_v54  ;;  %v1198_v59 = vld [vmem:[%s1581_s3 + $0x38] sm:$0xff]   ;;  %1129 = vmatpush3.bf16.msra.mxu0 %v1199_v60  ;;  %v1201_v62 = vld [vmem:[%s1583_s5 + $0x10] sm:$0xff]   ;;  %v1203_v0 = vld [vmem:[%s1583_s5 + $0x20] sm:$0xff]  }
  0x22   :  { %1057 = vmatmul.mubr.msk.bf16.gmra.mrb[8].mxu0 %vm115_vm0, %v65_v47  ;;  %1073 = vmatmul.mubr.msk.bf16.gmra.mrb[8].mxu1 %vm115_vm0, %v73_v49  ;;  %v1202_v63 = vld [vmem:[%s1583_s5 + $0x18] sm:$0xff]   ;;  %v1204_v1 = vld [vmem:[%s1583_s5 + $0x28] sm:$0xff]   ;;  %v1443_v2 = vld [vmem:[%s1580_s2] ss:$0 sm:$0xff] }
  0x23   :  { %1060 = vmatprep.mubr.msk.bf16.mxu0 %vm115_vm0, %v66_v48  ;;  %1076 = vmatprep.mubr.msk.bf16.mxu1 %vm115_vm0, %v74_v50 }
  0x24   :  { %1089 = vmatpush3.bf16.msra.mxu1 %v1195_v46  ;;  %1130 = vmatprep.subr.bf16.mxu0 %v1200_v61 }
  0x25   :  { %1090 = vmatprep.subr.bf16.mxu1 %v1196_v51  ;;  %1131 = vmatpush3.bf16.msra.mxu0 %v1200_v61 }
  0x26   :  { %1132 = vmatprep.subr.bf16.mxu0 %v1201_v62 }
  0x28   :  { %1091 = vmatpush3.bf16.msra.mxu1 %v1196_v51 }
  0x29   :  { %1092 = vmatprep.subr.bf16.mxu1 %v1197_v58  ;;  %1133 = vmatpush3.bf16.msra.mxu0 %v1201_v62 }
  0x2a   :  { %1061 = vmatmul.mubr.msk.bf16.gmra.mrb[12].mxu0 %vm115_vm0, %v67_v56  ;;  %1077 = vmatmul.mubr.msk.bf16.gmra.mrb[12].mxu1 %vm115_vm0, %v75_v57 }
  0x2b   :  { %1134 = vmatprep.subr.bf16.mxu0 %v1202_v63 }
  0x2c   :  { %1093 = vmatpush3.bf16.msra.mxu1 %v1197_v58 }
  0x2d   :  { %1094 = vmatprep.subr.bf16.mxu1 %v1198_v59  ;;  %1135 = vmatpush3.bf16.msra.mxu0 %v1202_v63 }
  0x2e   :  { %1136 = vmatprep.subr.bf16.mxu0 %v1203_v0 }
  0x30   :  { %1095 = vmatpush3.bf16.msra.mxu1 %v1198_v59 }
  0x31   :  { %1137 = vmatpush3.bf16.msra.mxu0 %v1203_v0 }
  0x32   :  { %1138 = vmatprep.subr.bf16.mxu0 %v1204_v1 }
  0x35   :  { %1139 = vmatpush3.bf16.msra.mxu0 %v1204_v1 }
  0xe5   :  { %v1050_v3 = vpop.f32.mrb[0].mxu0  ;;  %v1066_v6 = vpop.f32.mrb[0].mxu1 }
  0xe6   :  { %v207_v4 = vadd.f32 %v1050_v3, %v1443_v2  ;;  %v198_v5 = vpop.f32.mrb[1].mxu0  ;;  %v271_v9 = vadd.f32 %v1066_v6, %v1443_v2  ;;  %v262_v10 = vpop.f32.mrb[1].mxu1 }
  0xe7   :  { %v199_v7 = vadd.f32 %v1443_v2, %v198_v5  ;;  %v1051_v8 = vpop.f32.mrb[2].mxu0  ;;  %v263_v13 = vadd.f32 %v1443_v2, %v262_v10  ;;  %v1067_v14 = vpop.f32.mrb[2].mxu1 }
  0xe8   :  { %v210_v11 = vadd.f32 %v1051_v8, %v1443_v2  ;;  %v201_v12 = vpop.f32.mrb[3].mxu0  ;;  %v343_v16 = vmax.f32 %v271_v9, 0.0  ;;  %v274_v17 = vadd.f32 %v1067_v14, %v1443_v2  ;;  %v265_v18 = vpop.f32.mrb[3].mxu1  ;;  %v327_v19 = vmax.f32 %v207_v4, 0.0 }
  0xe9   :  { %v202_v15 = vadd.f32 %v1443_v2, %v201_v12  ;;  %v341_v21 = vmax.f32 %v263_v13, 0.0  ;;  %v266_v22 = vadd.f32 %v1443_v2, %v265_v18  ;;  %v325_v23 = vmax.f32 %v199_v7, 0.0 }
  0xea   :  { %v328_v20 = vmax.f32 %v210_v11, 0.0  ;;  %v344_v25 = vmax.f32 %v274_v17, 0.0 }
  0xeb   :  { %v326_v24 = vmax.f32 %v202_v15, 0.0  ;;  %v342_v27 = vmax.f32 %v266_v22, 0.0 }
  0xec   :  { %v358_v26 = vpack.c.bf16 %v328_v20, %v327_v19  ;;  %v1453_v30 = vpack.c.bf16 %v344_v25, %v343_v16 }
  0xed   :  { %v357_v28 = vpack.c.bf16 %v326_v24, %v325_v23  ;;  %v1054_v29 = vpop.f32.mrb[4].mxu0  ;;  %v1456_v33 = vpack.c.bf16 %v342_v27, %v341_v21  ;;  %v1070_v34 = vpop.f32.mrb[4].mxu1 }
  0xee   :  { %v223_v31 = vadd.f32 %v1054_v29, %v1443_v2  ;;  %v214_v32 = vpop.f32.mrb[5].mxu0  ;;  %v287_v37 = vadd.f32 %v1070_v34, %v1443_v2  ;;  %v278_v38 = vpop.f32.mrb[5].mxu1 }
  0xef   :  { %v215_v35 = vadd.f32 %v1443_v2, %v214_v32  ;;  %v1055_v36 = vpop.f32.mrb[6].mxu0  ;;  %1096 = vmatprep.mubr.bf16.mxu1 %v357_v28  ;;  %v279_v41 = vadd.f32 %v1443_v2, %v278_v38  ;;  %v1071_v42 = vpop.f32.mrb[6].mxu1 }
  0xf0   :  { %v226_v39 = vadd.f32 %v1055_v36, %v1443_v2  ;;  %v217_v40 = vpop.f32.mrb[7].mxu0  ;;  %1097 = vmatmul.mubr.bf16.vlgmr.msra.gmra.mrb[16].mxu1 %v358_v26  ;;  %v347_v44 = vmax.f32 %v287_v37, 0.0  ;;  %v290_v45 = vadd.f32 %v1071_v42, %v1443_v2  ;;  %v281_v46 = vpop.f32.mrb[7].mxu1  ;;  %v331_v47 = vmax.f32 %v223_v31, 0.0 }
  0xf1   :  { %v218_v43 = vadd.f32 %v1443_v2, %v217_v40  ;;  %v345_v49 = vmax.f32 %v279_v41, 0.0  ;;  %v282_v50 = vadd.f32 %v1443_v2, %v281_v46  ;;  %v329_v51 = vmax.f32 %v215_v35, 0.0 }
  0xf2   :  { %v332_v48 = vmax.f32 %v226_v39, 0.0  ;;  %v348_v53 = vmax.f32 %v290_v45, 0.0 }
  0xf3   :  { %v330_v52 = vmax.f32 %v218_v43, 0.0  ;;  %v346_v55 = vmax.f32 %v282_v50, 0.0 }
  0xf4   :  { %v360_v54 = vpack.c.bf16 %v332_v48, %v331_v47  ;;  %v1465_v58 = vpack.c.bf16 %v348_v53, %v347_v44 }
  0xf5   :  { %v359_v56 = vpack.c.bf16 %v330_v52, %v329_v51  ;;  %v1058_v57 = vpop.f32.mrb[8].mxu0  ;;  %v367_v61 = vpack.c.bf16 %v346_v55, %v345_v49  ;;  %v1074_v62 = vpop.f32.mrb[8].mxu1 }
  0xf6   :  { %v239_v59 = vadd.f32 %v1058_v57, %v1443_v2  ;;  %v230_v60 = vpop.f32.mrb[9].mxu0  ;;  %v303_v1 = vadd.f32 %v1074_v62, %v1443_v2  ;;  %v294_v3 = vpop.f32.mrb[9].mxu1 }
  0xf7   :  { %v231_v63 = vadd.f32 %v1443_v2, %v230_v60  ;;  %v1059_v0 = vpop.f32.mrb[10].mxu0  ;;  %1100 = vmatprep.mubr.bf16.mxu1 %v359_v56  ;;  %v295_v6 = vadd.f32 %v1443_v2, %v294_v3  ;;  %v1075_v7 = vpop.f32.mrb[10].mxu1 }
  0xf8   :  { %v242_v4 = vadd.f32 %v1059_v0, %v1443_v2  ;;  %v233_v5 = vpop.f32.mrb[11].mxu0  ;;  %1101 = vmatmul.mubr.bf16.gmra.mrb[20].mxu1 %v360_v54  ;;  %v351_v9 = vmax.f32 %v303_v1, 0.0  ;;  %v306_v10 = vadd.f32 %v1075_v7, %v1443_v2  ;;  %v297_v11 = vpop.f32.mrb[11].mxu1  ;;  %v335_v12 = vmax.f32 %v239_v59, 0.0  ;;  %v1206_v54 = vld [vmem:[%s1583_s5 + $0x38] sm:$0xff]  }
  0xf9   :  { %v234_v8 = vadd.f32 %v1443_v2, %v233_v5  ;;  %v349_v14 = vmax.f32 %v295_v6, 0.0  ;;  %v298_v15 = vadd.f32 %v1443_v2, %v297_v11  ;;  %v333_v16 = vmax.f32 %v231_v63, 0.0 }
  0xfa   :  { %v336_v13 = vmax.f32 %v242_v4, 0.0  ;;  %v352_v18 = vmax.f32 %v306_v10, 0.0 }
  0xfb   :  { %v334_v17 = vmax.f32 %v234_v8, 0.0  ;;  %v350_v20 = vmax.f32 %v298_v15, 0.0 }
  0xfc   :  { %v362_v19 = vpack.c.bf16 %v336_v13, %v335_v12  ;;  %v370_v23 = vpack.c.bf16 %v352_v18, %v351_v9 }
  0xfd   :  { %v361_v21 = vpack.c.bf16 %v334_v17, %v333_v16  ;;  %v1062_v22 = vpop.f32.mrb[12].mxu0  ;;  %v369_v26 = vpack.c.bf16 %v350_v20, %v349_v14  ;;  %v1078_v27 = vpop.f32.mrb[12].mxu1 }
  0xfe   :  { %v255_v24 = vadd.f32 %v1062_v22, %v1443_v2  ;;  %v246_v25 = vpop.f32.mrb[13].mxu0  ;;  %v319_v31 = vadd.f32 %v1078_v27, %v1443_v2  ;;  %v310_v32 = vpop.f32.mrb[13].mxu1 }
  0xff   :  { %v247_v28 = vadd.f32 %v1443_v2, %v246_v25  ;;  %v1063_v29 = vpop.f32.mrb[14].mxu0  ;;  %1104 = vmatprep.mubr.bf16.mxu1 %v361_v21  ;;  %v311_v36 = vadd.f32 %v1443_v2, %v310_v32  ;;  %v1079_v37 = vpop.f32.mrb[14].mxu1 }
 0x100   :  { %v258_v34 = vadd.f32 %v1063_v29, %v1443_v2  ;;  %v249_v35 = vpop.f32.mrb[15].mxu0  ;;  %1105 = vmatmul.mubr.bf16.gmra.mrb[24].mxu1 %v362_v19  ;;  %v355_v39 = vmax.f32 %v319_v31, 0.0  ;;  %v322_v40 = vadd.f32 %v1079_v37, %v1443_v2  ;;  %v313_v41 = vpop.f32.mrb[15].mxu1  ;;  %v339_v42 = vmax.f32 %v255_v24, 0.0 }
 0x101   :  { %v250_v38 = vadd.f32 %v1443_v2, %v249_v35  ;;  %v353_v44 = vmax.f32 %v311_v36, 0.0  ;;  %v314_v45 = vadd.f32 %v1443_v2, %v313_v41  ;;  %v337_v46 = vmax.f32 %v247_v28, 0.0  ;;  %v1205_v2 = vld [vmem:[%s1583_s5 + $0x30] sm:$0xff]  }
 0x102   :  { %v340_v43 = vmax.f32 %v258_v34, 0.0  ;;  %v356_v48 = vmax.f32 %v322_v40, 0.0  ;;  %1140 = vmatprep.subr.bf16.mxu0 %v1205_v2 }
 0x103   :  { %v338_v47 = vmax.f32 %v250_v38, 0.0  ;;  %v354_v50 = vmax.f32 %v314_v45, 0.0  ;;  %1141 = vmatpush3.bf16.msra.mxu0 %v1205_v2 }
 0x104   :  { %v364_v49 = vpack.c.bf16 %v340_v43, %v339_v42  ;;  %v372_v52 = vpack.c.bf16 %v356_v48, %v355_v39  ;;  %1142 = vmatprep.subr.bf16.mxu0 %v1206_v54 }
 0x105   :  { %v363_v51 = vpack.c.bf16 %v338_v47, %v337_v46  ;;  %v371_v53 = vpack.c.bf16 %v354_v50, %v353_v44 }
 0x107   :  { %1108 = vmatprep.mubr.bf16.mxu1 %v363_v51  ;;  %1143 = vmatpush3.bf16.msra.mxu0 %v1206_v54 }
 0x108   :  { %1109 = vmatmul.mubr.bf16.gmra.mrb[28].mxu1 %v364_v49 }
 0x109   :  { %1112 = vmatprep.mubr.bf16.mxu1 %v1456_v33 }
 0x110   :  { %1113 = vmatmul.mubr.bf16.gmra.mrb[32].mxu1 %v1453_v30  ;;  %v1495_v30 = vld [vmem:[%s1582_s4] ss:$0 sm:$0xff] }
 0x111   :  { %1116 = vmatprep.mubr.bf16.mxu1 %v367_v61 }
 0x118   :  { %1117 = vmatmul.mubr.bf16.gmra.mrb[36].mxu1 %v1465_v58 }
 0x119   :  { %1120 = vmatprep.mubr.bf16.mxu1 %v369_v26 }
 0x120   :  { %1121 = vmatmul.mubr.bf16.gmra.mrb[40].mxu1 %v370_v23 }
 0x121   :  { %1124 = vmatprep.mubr.bf16.mxu1 %v371_v53 }
 0x128   :  { %1125 = vmatmul.mubr.bf16.gmra.mrb[44].mxu1 %v372_v52 }
 0x1c3   :  { %v1098_v33 = vpop.f32.mrb[16].mxu1 }
 0x1c4   :  { %v487_v55 = vadd.f32 %v1098_v33, %v1495_v30  ;;  %v478_v56 = vpop.f32.mrb[17].mxu1 }
 0x1c5   :  { %v479_v57 = vadd.f32 %v1495_v30, %v478_v56  ;;  %v1099_v58 = vpop.f32.mrb[18].mxu1 }
 0x1c6   :  { %v490_v59 = vadd.f32 %v1099_v58, %v1495_v30  ;;  %v481_v60 = vpop.f32.mrb[19].mxu1  ;;  %v607_v62 = vmax.f32 %v487_v55, 0.0 }
 0x1c7   :  { %v482_v61 = vadd.f32 %v1495_v30, %v481_v60  ;;  %v605_v0 = vmax.f32 %v479_v57, 0.0 }
 0x1c8   :  { %v608_v63 = vmax.f32 %v490_v59, 0.0 }
 0x1c9   :  { %v606_v1 = vmax.f32 %v482_v61, 0.0 }
 0x1ca   :  { %v638_v3 = vpack.c.bf16 %v608_v63, %v607_v62 }
 0x1cb   :  { %v637_v4 = vpack.c.bf16 %v606_v1, %v605_v0  ;;  %v1102_v5 = vpop.f32.mrb[20].mxu1 }
 0x1cc   :  { %v503_v6 = vadd.f32 %v1102_v5, %v1495_v30  ;;  %v494_v7 = vpop.f32.mrb[21].mxu1 }
 0x1cd   :  { %v495_v8 = vadd.f32 %v1495_v30, %v494_v7  ;;  %v1103_v9 = vpop.f32.mrb[22].mxu1  ;;  %1144 = vmatprep.mubr.bf16.mxu0 %v637_v4 }
 0x1ce   :  { %v506_v10 = vadd.f32 %v1103_v9, %v1495_v30  ;;  %v497_v11 = vpop.f32.mrb[23].mxu1  ;;  %1145 = vmatmul.mubr.bf16.vlgmr.msra.gmra.mrb[16].mxu0 %v638_v3  ;;  %v611_v13 = vmax.f32 %v503_v6, 0.0 }
 0x1cf   :  { %v498_v12 = vadd.f32 %v1495_v30, %v497_v11  ;;  %v609_v15 = vmax.f32 %v495_v8, 0.0 }
 0x1d0   :  { %v612_v14 = vmax.f32 %v506_v10, 0.0 }
 0x1d1   :  { %v610_v16 = vmax.f32 %v498_v12, 0.0 }
 0x1d2   :  { %v640_v17 = vpack.c.bf16 %v612_v14, %v611_v13 }
 0x1d3   :  { %v639_v18 = vpack.c.bf16 %v610_v16, %v609_v15  ;;  %v1106_v19 = vpop.f32.mrb[24].mxu1 }
 0x1d4   :  { %v519_v20 = vadd.f32 %v1106_v19, %v1495_v30  ;;  %v510_v21 = vpop.f32.mrb[25].mxu1 }
 0x1d5   :  { %v511_v22 = vadd.f32 %v1495_v30, %v510_v21  ;;  %v1107_v23 = vpop.f32.mrb[26].mxu1  ;;  %1148 = vmatprep.mubr.bf16.mxu0 %v639_v18 }
 0x1d6   :  { %v522_v24 = vadd.f32 %v1107_v23, %v1495_v30  ;;  %v513_v25 = vpop.f32.mrb[27].mxu1  ;;  %1149 = vmatmul.mubr.bf16.gmra.mrb[20].mxu0 %v640_v17  ;;  %v615_v27 = vmax.f32 %v519_v20, 0.0 }
 0x1d7   :  { %v514_v26 = vadd.f32 %v1495_v30, %v513_v25  ;;  %v613_v29 = vmax.f32 %v511_v22, 0.0 }
 0x1d8   :  { %v616_v28 = vmax.f32 %v522_v24, 0.0 }
 0x1d9   :  { %v614_v31 = vmax.f32 %v514_v26, 0.0 }
 0x1da   :  { %v642_v32 = vpack.c.bf16 %v616_v28, %v615_v27 }
 0x1db   :  { %v641_v34 = vpack.c.bf16 %v614_v31, %v613_v29  ;;  %v1110_v35 = vpop.f32.mrb[28].mxu1 }
 0x1dc   :  { %v535_v36 = vadd.f32 %v1110_v35, %v1495_v30  ;;  %v526_v37 = vpop.f32.mrb[29].mxu1 }
 0x1dd   :  { %v527_v38 = vadd.f32 %v1495_v30, %v526_v37  ;;  %v1111_v39 = vpop.f32.mrb[30].mxu1  ;;  %1152 = vmatprep.mubr.bf16.mxu0 %v641_v34 }
 0x1de   :  { %v538_v40 = vadd.f32 %v1111_v39, %v1495_v30  ;;  %v529_v41 = vpop.f32.mrb[31].mxu1  ;;  %1153 = vmatmul.mubr.bf16.gmra.mrb[24].mxu0 %v642_v32  ;;  %v619_v43 = vmax.f32 %v535_v36, 0.0 }
 0x1df   :  { %v530_v42 = vadd.f32 %v1495_v30, %v529_v41  ;;  %v617_v45 = vmax.f32 %v527_v38, 0.0 }
 0x1e0   :  { %v620_v44 = vmax.f32 %v538_v40, 0.0 }
 0x1e1   :  { %v618_v46 = vmax.f32 %v530_v42, 0.0  ;;  %v1532_v42 = vld [vmem:[%s1584_s6] ss:$0 sm:$0xff]  ;;  %s1231_s6 = smov [#allocation2]  }
 0x1e2   :  { %v644_v47 = vpack.c.bf16 %v620_v44, %v619_v43  ;;  %s922_s10 = sshll.u32 %s1231_s6, 4  ;;  %s923_s10 = int_to_ptr.vmem [resolvable:$true] %s922_s10 }
 0x1e3   :  { %v643_v48 = vpack.c.bf16 %v618_v46, %v617_v45  ;;  %v1114_v49 = vpop.f32.mrb[32].mxu1  ;;  %s1207_s11 = scalar_lea.vmem %s923_s10, 4096  ;;  %p1212_p1 = scmp.lt.s32.totalorder %s923_s10, %s923_s10 }
 0x1e4   :  { %v551_v50 = vadd.f32 %v1114_v49, %v1495_v30  ;;  %v542_v51 = vpop.f32.mrb[33].mxu1  ;;  %p1208_p0 = scmp.ne.s32.totalorder %s923_s10, %s1207_s11  ;;  %p1213_p2 = scmp.lt.s32.totalorder %s1207_s11, %s1207_s11 }
 0x1e5   :  { %v543_v52 = vadd.f32 %v1495_v30, %v542_v51  ;;  %v1115_v53 = vpop.f32.mrb[34].mxu1  ;;  %1156 = vmatprep.mubr.bf16.mxu0 %v643_v48 }
 0x1e6   :  { %v554_v2 = vadd.f32 %v1115_v53, %v1495_v30  ;;  %v545_v54 = vpop.f32.mrb[35].mxu1  ;;  %1157 = vmatmul.mubr.bf16.gmra.mrb[28].mxu0 %v644_v47  ;;  %v623_v55 = vmax.f32 %v551_v50, 0.0  ;;  %p1214_p3 = por %p1213_p2, %p1212_p1 }
 0x1e7   :  { %v546_v33 = vadd.f32 %v1495_v30, %v545_v54  ;;  %v621_v57 = vmax.f32 %v543_v52, 0.0 }
 0x1e8   :  { %v624_v56 = vmax.f32 %v554_v2, 0.0  ;;  %p1215_p4 = pnand %p1214_p3, %p1208_p0 }
 0x1e9   :  { %v622_v58 = vmax.f32 %v546_v33, 0.0 }
 0x1ea   :  { %v646_v59 = vpack.c.bf16 %v624_v56, %v623_v55 }
 0x1eb   :  { %v645_v60 = vpack.c.bf16 %v622_v58, %v621_v57  ;;  %v1118_v61 = vpop.f32.mrb[36].mxu1 }
 0x1ec   :  { %v567_v62 = vadd.f32 %v1118_v61, %v1495_v30  ;;  %v558_v63 = vpop.f32.mrb[37].mxu1 }
 0x1ed   :  { %v559_v0 = vadd.f32 %v1495_v30, %v558_v63  ;;  %v1119_v1 = vpop.f32.mrb[38].mxu1  ;;  %1160 = vmatprep.mubr.bf16.mxu0 %v645_v60 }
 0x1ee   :  { %v570_v3 = vadd.f32 %v1119_v1, %v1495_v30  ;;  %v561_v4 = vpop.f32.mrb[39].mxu1  ;;  %1161 = vmatmul.mubr.bf16.gmra.mrb[32].mxu0 %v646_v59  ;;  %v627_v6 = vmax.f32 %v567_v62, 0.0 }
 0x1ef   :  { %v562_v5 = vadd.f32 %v1495_v30, %v561_v4  ;;  %v625_v8 = vmax.f32 %v559_v0, 0.0 }
 0x1f0   :  { %v628_v7 = vmax.f32 %v570_v3, 0.0 }
 0x1f1   :  { %v626_v9 = vmax.f32 %v562_v5, 0.0 }
 0x1f2   :  { %v648_v10 = vpack.c.bf16 %v628_v7, %v627_v6 }
 0x1f3   :  { %v647_v11 = vpack.c.bf16 %v626_v9, %v625_v8  ;;  %v1122_v12 = vpop.f32.mrb[40].mxu1 }
 0x1f4   :  { %v583_v13 = vadd.f32 %v1122_v12, %v1495_v30  ;;  %v574_v14 = vpop.f32.mrb[41].mxu1 }
 0x1f5   :  { %v575_v15 = vadd.f32 %v1495_v30, %v574_v14  ;;  %v1123_v16 = vpop.f32.mrb[42].mxu1  ;;  %1164 = vmatprep.mubr.bf16.mxu0 %v647_v11 }
 0x1f6   :  { %v586_v17 = vadd.f32 %v1123_v16, %v1495_v30  ;;  %v577_v18 = vpop.f32.mrb[43].mxu1  ;;  %1165 = vmatmul.mubr.bf16.gmra.mrb[36].mxu0 %v648_v10  ;;  %v631_v20 = vmax.f32 %v583_v13, 0.0 }
 0x1f7   :  { %v578_v19 = vadd.f32 %v1495_v30, %v577_v18  ;;  %v629_v22 = vmax.f32 %v575_v15, 0.0 }
 0x1f8   :  { %v632_v21 = vmax.f32 %v586_v17, 0.0 }
 0x1f9   :  { %v630_v23 = vmax.f32 %v578_v19, 0.0 }
 0x1fa   :  { %v650_v24 = vpack.c.bf16 %v632_v21, %v631_v20 }
 0x1fb   :  { %v649_v25 = vpack.c.bf16 %v630_v23, %v629_v22  ;;  %v1126_v26 = vpop.f32.mrb[44].mxu1 }
 0x1fc   :  { %v599_v27 = vadd.f32 %v1126_v26, %v1495_v30  ;;  %v590_v28 = vpop.f32.mrb[45].mxu1 }
 0x1fd   :  { %v591_v29 = vadd.f32 %v1495_v30, %v590_v28  ;;  %v1127_v31 = vpop.f32.mrb[46].mxu1  ;;  %1168 = vmatprep.mubr.bf16.mxu0 %v649_v25 }
 0x1fe   :  { %v602_v32 = vadd.f32 %v1127_v31, %v1495_v30  ;;  %v593_v34 = vpop.f32.mrb[47].mxu1  ;;  %1169 = vmatmul.mubr.bf16.gmra.mrb[40].mxu0 %v650_v24  ;;  %v635_v36 = vmax.f32 %v599_v27, 0.0 }
 0x1ff   :  { %v594_v35 = vadd.f32 %v1495_v30, %v593_v34  ;;  %v633_v38 = vmax.f32 %v591_v29, 0.0 }
 0x200   :  { %v636_v37 = vmax.f32 %v602_v32, 0.0 }
 0x201   :  { %v634_v39 = vmax.f32 %v594_v35, 0.0 }
 0x202   :  { %v652_v40 = vpack.c.bf16 %v636_v37, %v635_v36 }
 0x203   :  { %v651_v41 = vpack.c.bf16 %v634_v39, %v633_v38 }
 0x205   :  { %1172 = vmatprep.mubr.bf16.mxu0 %v651_v41 }
 0x206   :  { %1173 = vmatmul.mubr.bf16.gmra.mrb[44].mxu0 %v652_v40 }
 0x2a1   :  { %v1146_v43 = vpop.f32.mrb[16].mxu0 }
 0x2a2   :  { %v767_v44 = vadd.f32 %v1146_v43, %v1532_v42  ;;  %v758_v45 = vpop.f32.mrb[17].mxu0 }
 0x2a3   :  { %v759_v46 = vadd.f32 %v1532_v42, %v758_v45  ;;  %v1147_v30 = vpop.f32.mrb[18].mxu0 }
 0x2a4   :  { %887 = vst [vmem:[#allocation2 + $0x10] sm:$0xff] %v767_v44  ;;  %v770_v47 = vadd.f32 %v1147_v30, %v1532_v42  ;;  %v761_v48 = vpop.f32.mrb[19].mxu0 }
 0x2a5   :  { %885 = vst [vmem:[#allocation2] sm:$0xff] %v759_v46  ;;  %v762_v49 = vadd.f32 %v1532_v42, %v761_v48 }
 0x2a6   :  { %888 = vst [vmem:[#allocation2 + $0x18] sm:$0xff] %v770_v47 }
 0x2a7   :  { %886 = vst [vmem:[#allocation2 + $0x8] sm:$0xff] %v762_v49 }
 0x2a9   :  { %v1150_v50 = vpop.f32.mrb[20].mxu0 }
 0x2aa   :  { %v783_v51 = vadd.f32 %v1150_v50, %v1532_v42  ;;  %v774_v52 = vpop.f32.mrb[21].mxu0 }
 0x2ab   :  { %v775_v53 = vadd.f32 %v1532_v42, %v774_v52  ;;  %v1151_v2 = vpop.f32.mrb[22].mxu0 }
 0x2ac   :  { %891 = vst [vmem:[#allocation2 + $0x30] sm:$0xff] %v783_v51  ;;  %v786_v54 = vadd.f32 %v1151_v2, %v1532_v42  ;;  %v777_v33 = vpop.f32.mrb[23].mxu0 }
 0x2ad   :  { %889 = vst [vmem:[#allocation2 + $0x20] sm:$0xff] %v775_v53  ;;  %v778_v55 = vadd.f32 %v1532_v42, %v777_v33 }
 0x2ae   :  { %892 = vst [vmem:[#allocation2 + $0x38] sm:$0xff] %v786_v54 }
 0x2af   :  { %890 = vst [vmem:[#allocation2 + $0x28] sm:$0xff] %v778_v55 }
 0x2b1   :  { %v1154_v56 = vpop.f32.mrb[24].mxu0 }
 0x2b2   :  { %v799_v57 = vadd.f32 %v1154_v56, %v1532_v42  ;;  %v790_v58 = vpop.f32.mrb[25].mxu0 }
 0x2b3   :  { %v791_v59 = vadd.f32 %v1532_v42, %v790_v58  ;;  %v1155_v60 = vpop.f32.mrb[26].mxu0 }
 0x2b4   :  { %895 = vst [vmem:[#allocation2 + $0x50] sm:$0xff] %v799_v57  ;;  %v802_v61 = vadd.f32 %v1155_v60, %v1532_v42  ;;  %v793_v62 = vpop.f32.mrb[27].mxu0 }
 0x2b5   :  { %893 = vst [vmem:[#allocation2 + $0x40] sm:$0xff] %v791_v59  ;;  %v794_v63 = vadd.f32 %v1532_v42, %v793_v62 }
 0x2b6   :  { %896 = vst [vmem:[#allocation2 + $0x58] sm:$0xff] %v802_v61 }
 0x2b7   :  { %894 = vst [vmem:[#allocation2 + $0x48] sm:$0xff] %v794_v63 }
 0x2b9   :  { %v1158_v0 = vpop.f32.mrb[28].mxu0 }
 0x2ba   :  { %v815_v1 = vadd.f32 %v1158_v0, %v1532_v42  ;;  %v806_v3 = vpop.f32.mrb[29].mxu0 }
 0x2bb   :  { %v807_v4 = vadd.f32 %v1532_v42, %v806_v3  ;;  %v1159_v5 = vpop.f32.mrb[30].mxu0 }
 0x2bc   :  { %899 = vst [vmem:[#allocation2 + $0x70] sm:$0xff] %v815_v1  ;;  %v818_v6 = vadd.f32 %v1159_v5, %v1532_v42  ;;  %v809_v7 = vpop.f32.mrb[31].mxu0 }
 0x2bd   :  { %897 = vst [vmem:[#allocation2 + $0x60] sm:$0xff] %v807_v4  ;;  %v810_v8 = vadd.f32 %v1532_v42, %v809_v7 }
 0x2be   :  { %900 = vst [vmem:[#allocation2 + $0x78] sm:$0xff] %v818_v6 }
 0x2bf   :  { %898 = vst [vmem:[#allocation2 + $0x68] sm:$0xff] %v810_v8 }
 0x2c1   :  { %v1162_v9 = vpop.f32.mrb[32].mxu0 }
 0x2c2   :  { %v831_v10 = vadd.f32 %v1162_v9, %v1532_v42  ;;  %v822_v11 = vpop.f32.mrb[33].mxu0 }
 0x2c3   :  { %v823_v12 = vadd.f32 %v1532_v42, %v822_v11  ;;  %v1163_v13 = vpop.f32.mrb[34].mxu0 }
 0x2c4   :  { %903 = vst [vmem:[#allocation2 + $0x90] sm:$0xff] %v831_v10  ;;  %v834_v14 = vadd.f32 %v1163_v13, %v1532_v42  ;;  %v825_v15 = vpop.f32.mrb[35].mxu0 }
 0x2c5   :  { %901 = vst [vmem:[#allocation2 + $0x80] sm:$0xff] %v823_v12  ;;  %v826_v16 = vadd.f32 %v1532_v42, %v825_v15 }
 0x2c6   :  { %904 = vst [vmem:[#allocation2 + $0x98] sm:$0xff] %v834_v14 }
 0x2c7   :  { %902 = vst [vmem:[#allocation2 + $0x88] sm:$0xff] %v826_v16 }
 0x2c9   :  { %v1166_v17 = vpop.f32.mrb[36].mxu0 }
 0x2ca   :  { %v847_v18 = vadd.f32 %v1166_v17, %v1532_v42  ;;  %v838_v19 = vpop.f32.mrb[37].mxu0 }
 0x2cb   :  { %v839_v20 = vadd.f32 %v1532_v42, %v838_v19  ;;  %v1167_v21 = vpop.f32.mrb[38].mxu0 }
 0x2cc   :  { %907 = vst [vmem:[#allocation2 + $0xb0] sm:$0xff] %v847_v18  ;;  %v850_v22 = vadd.f32 %v1167_v21, %v1532_v42  ;;  %v841_v23 = vpop.f32.mrb[39].mxu0 }
 0x2cd   :  { %905 = vst [vmem:[#allocation2 + $0xa0] sm:$0xff] %v839_v20  ;;  %v842_v24 = vadd.f32 %v1532_v42, %v841_v23 }
 0x2ce   :  { %908 = vst [vmem:[#allocation2 + $0xb8] sm:$0xff] %v850_v22 }
 0x2cf   :  { %906 = vst [vmem:[#allocation2 + $0xa8] sm:$0xff] %v842_v24 }
 0x2d1   :  { %v1170_v25 = vpop.f32.mrb[40].mxu0 }
 0x2d2   :  { %v863_v26 = vadd.f32 %v1170_v25, %v1532_v42  ;;  %v854_v27 = vpop.f32.mrb[41].mxu0 }
 0x2d3   :  { %v855_v28 = vadd.f32 %v1532_v42, %v854_v27  ;;  %v1171_v29 = vpop.f32.mrb[42].mxu0 }
 0x2d4   :  { %911 = vst [vmem:[#allocation2 + $0xd0] sm:$0xff] %v863_v26  ;;  %v866_v31 = vadd.f32 %v1171_v29, %v1532_v42  ;;  %v857_v32 = vpop.f32.mrb[43].mxu0 }
 0x2d5   :  { %909 = vst [vmem:[#allocation2 + $0xc0] sm:$0xff] %v855_v28  ;;  %v858_v34 = vadd.f32 %v1532_v42, %v857_v32 }
 0x2d6   :  { %912 = vst [vmem:[#allocation2 + $0xd8] sm:$0xff] %v866_v31 }
 0x2d7   :  { %910 = vst [vmem:[#allocation2 + $0xc8] sm:$0xff] %v858_v34 }
 0x2d9   :  { %v1174_v35 = vpop.f32.mrb[44].mxu0 }
 0x2da   :  { %v879_v36 = vadd.f32 %v1174_v35, %v1532_v42  ;;  %v870_v37 = vpop.f32.mrb[45].mxu0 }
 0x2db   :  { %v871_v38 = vadd.f32 %v1532_v42, %v870_v37  ;;  %v1175_v39 = vpop.f32.mrb[46].mxu0 }
 0x2dc   :  { %915 = vst [vmem:[#allocation2 + $0xf0] sm:$0xff] %v879_v36  ;;  %v882_v40 = vadd.f32 %v1175_v39, %v1532_v42  ;;  %v873_v41 = vpop.f32.mrb[47].mxu0 }
 0x2dd   :  { %913 = vst [vmem:[#allocation2 + $0xe0] sm:$0xff] %v871_v38  ;;  %v874_v43 = vadd.f32 %v1532_v42, %v873_v41 }
 0x2de   :  { %916 = vst [vmem:[#allocation2 + $0xf8] sm:$0xff] %v882_v40 }
 0x2df   :  { %914 = vst [vmem:[#allocation2 + $0xe8] sm:$0xff] %v874_v43 }
 0x2e0   :  { %1218 = shalt.err (!%p1215_p4)
}
 0x2e1   :  { %s1219_s14 = scalar_lea.hbm %s1585_s7, 4096 }
 0x2e2   :  { %p1220_p5 = scmp.ne.s32.totalorder %s1585_s7, %s1219_s14  ;;  %p1223_p6 = scmp.lt.u32.totalorder %s1219_s14, %s1585_s7 }
 0x2e4   :  { %p1225_p7 = pnand %p1223_p6, %p1220_p5 }
 0x2e6   :  { %1228 = shalt.err (!%p1225_p7)
}
 0x2e7   :  { %s1232_s18 = smov 128   ;;  %s1233_s19 = smov 8  }
 0x2e8   :  { %928 = dma.vmem_to_hbm [thread:$0]  %s923_s10, 4096, %s1585_s7, [#allocation3], %s1232_s18, %s1232_s18, %s1233_s19  }
 0x2e9   :  { %1229 = dma.done.wait [#allocation3], 4096  }
 0x2ea   :  { %1230 = vsyncadd [#allocation3], 4294963200 }
 0x2eb   :  { %932 = vsyncpa [#allocation3], 1 }

</bundles_post_ra>
